<compile_context>
chip_gen: v7x
topology: tpu7x:2x2x1
jax: 0.10.0
libtpu: 0.0.40
codegen_flags: <defaults>
</compile_context>

<pallas_src>
from functools import partial

import jax
import jax.numpy as jnp
from jax.experimental import pallas as pl
from jax.experimental.pallas import tpu as pltpu


# ----------------------------- Pallas kernels ------------------------------

def _pool_cse_kernel(x_ref, w1_ref, b1_ref, w2_ref, b2_ref, cse_ref, acc_ref,
                     *, inv_n):
    """Fused AdaptiveAvgPool3d(1) + Conv1x1 -> ReLU -> Conv1x1 -> Sigmoid.

    grid = (B, num_spatial_tiles); the spatial-tile axis is the reduction axis.
    x_ref:   (1, C, tn) tile of x laid out as (B, C, N)
    w1_ref:  (Cr, C), b1_ref: (Cr, 1)   -- first 1x1 ACS conv (pointwise)
    w2_ref:  (C, Cr), b2_ref: (C, 1)    -- second 1x1 ACS conv (pointwise)
    cse_ref: (1, C, 1) per-batch channel scale (output, resident across tiles)
    acc_ref: (C, 1) f32 running spatial sum (VMEM scratch)
    """
    t = pl.program_id(1)

    @pl.when(t == 0)
    def _():
        acc_ref[...] = jnp.zeros_like(acc_ref)

    x = x_ref[0].astype(jnp.float32)                         # (C, tn)
    acc_ref[...] += jnp.sum(x, axis=-1, keepdims=True)       # lane reduce -> (C,1)

    @pl.when(t == pl.num_programs(1) - 1)
    def _():
        pooled = acc_ref[...] * inv_n                        # (C, 1) global mean
        z = jnp.dot(w1_ref[...], pooled,
                    preferred_element_type=jnp.float32) + b1_ref[...]   # (Cr, 1)
        z = jnp.maximum(z, 0.0)                              # ReLU
        s = jnp.dot(w2_ref[...], z,
                    preferred_element_type=jnp.float32) + b2_ref[...]   # (C, 1)
        cse_ref[0] = jax.nn.sigmoid(s).astype(cse_ref.dtype)


def _sse_combine_kernel(x_ref, ws_ref, bs_ref, cse_ref, o_ref):
    """Fused sSE (Conv1x1 -> Sigmoid) + final x*cSE + x*sSE combine.

    x_ref:   (1, C, tn) tile of x
    ws_ref:  (C, 1) sSE pointwise weight, bs_ref: (1, 1) bias
    cse_ref: (1, C, 1) per-batch channel scale from kernel A
    o_ref:   (1, C, tn) output tile
    """
    x = x_ref[0].astype(jnp.float32)                          # (C, tn)
    logit = jnp.sum(x * ws_ref[...], axis=0, keepdims=True) + bs_ref[...]  # (1, tn)
    sse = jax.nn.sigmoid(logit)                               # (1, tn)
    cse = cse_ref[0].astype(jnp.float32)                      # (C, 1)
    o_ref[0] = (x * cse + x * sse).astype(o_ref.dtype)


# --------------------------- pallas_call wrapper ----------------------------

def scse_module_acs_forward(x, params, *, tile_n=1024):
    """Equivalent of SCSEModuleAcs.forward.  x: (B, C, H, W, D) -> same shape."""
    B, C, H, W, D = x.shape
    N = H * W * D
    x3 = x.reshape(B, C, N)                                   # free reshape

    # Spatial tile: multiple of 128 lanes when possible, must divide N.
    tn = min(tile_n, N)
    while N % tn:
        tn //= 2
    tn = max(tn, 1)
    num_t = N // tn

    Cr = params['cse_w1'].shape[0]

    # Kernel A: global average pool + cSE bottleneck MLP (one pass over x).
    cse = pl.pallas_call(
        partial(_pool_cse_kernel, inv_n=1.0 / float(N)),
        out_shape=jax.ShapeDtypeStruct((B, C, 1), jnp.float32),
        grid=(B, num_t),
        in_specs=[
            pl.BlockSpec((1, C, tn), lambda b, t: (b, 0, t)),
            pl.BlockSpec((Cr, C), lambda b, t: (0, 0)),
            pl.BlockSpec((Cr, 1), lambda b, t: (0, 0)),
            pl.BlockSpec((C, Cr), lambda b, t: (0, 0)),
            pl.BlockSpec((C, 1), lambda b, t: (0, 0)),
        ],
        out_specs=pl.BlockSpec((1, C, 1), lambda b, t: (b, 0, 0)),
        scratch_shapes=[pltpu.VMEM((C, 1), jnp.float32)],
        compiler_params=pltpu.CompilerParams(
            dimension_semantics=("parallel", "arbitrary")),
    )(x3, params['cse_w1'], params['cse_b1'], params['cse_w2'], params['cse_b2'])

    # Kernel B: sSE + sigmoid + x*cSE + x*sSE (second pass over x).
    out3 = pl.pallas_call(
        _sse_combine_kernel,
        out_shape=jax.ShapeDtypeStruct((B, C, N), x.dtype),
        grid=(B, num_t),
        in_specs=[
            pl.BlockSpec((1, C, tn), lambda b, t: (b, 0, t)),
            pl.BlockSpec((C, 1), lambda b, t: (0, 0)),
            pl.BlockSpec((1, 1), lambda b, t: (0, 0)),
            pl.BlockSpec((1, C, 1), lambda b, t: (b, 0, 0)),
        ],
        out_specs=pl.BlockSpec((1, C, tn), lambda b, t: (b, 0, t)),
        compiler_params=pltpu.CompilerParams(
            dimension_semantics=("parallel", "parallel")),
    )(x3, params['sse_w'], params['sse_b'], cse)

    return out3.reshape(B, C, H, W, D)


# --------------------------- params & reference ------------------------------

def init_params(key, in_channels, reduction=16):
    """Kernel-ready parameter shapes (pre-reshaped once, outside the forward).

    PyTorch correspondence (ACSConv k=1 weight (Co, Ci, 1, 1)):
      cSE conv1: (C/r, C, 1, 1) -> cse_w1 (C/r, C), bias (C/r,)  -> (C/r, 1)
      cSE conv2: (C, C/r, 1, 1) -> cse_w2 (C, C/r), bias (C,)    -> (C, 1)
      sSE conv : (1, C, 1, 1)   -> sse_w  (C, 1),   bias (1,)    -> (1, 1)
    """
    C = in_channels
    Cr = max(C // reduction, 1)
    k1, k2, k3, k4, k5, k6 = jax.random.split(key, 6)
    nrm = lambda k, s, scale=0.1: scale * jax.random.normal(k, s, jnp.float32)
    return {
        'cse_w1': nrm(k1, (Cr, C)),
        'cse_b1': nrm(k2, (Cr, 1)),
        'cse_w2': nrm(k3, (C, Cr)),
        'cse_b2': nrm(k4, (C, 1)),
        'sse_w': nrm(k5, (C, 1)),
        'sse_b': nrm(k6, (1, 1)),
    }


def scse_reference(x, params):
    """Pure-JAX reference matching the PyTorch forward."""
    pooled = jnp.mean(x, axis=(2, 3, 4))                                   # (B, C)
    z = jnp.maximum(pooled @ params['cse_w1'].T + params['cse_b1'][:, 0], 0.0)
    s = jax.nn.sigmoid(z @ params['cse_w2'].T + params['cse_b2'][:, 0])    # (B, C)
    cse = s[:, :, None, None, None]
    logit = jnp.einsum('bchwd,c->bhwd', x, params['sse_w'][:, 0]) + params['sse_b'][0, 0]
    sse = jax.nn.sigmoid(logit)[:, None]
    return x * cse + x * sse


# --------------------------------- main --------------------------------------

if __name__ == "__main__":
    key = jax.random.PRNGKey(0)
    kx, kp = jax.random.split(key)

    # in_channels chosen = 128 so the channel dim fills lanes/sublanes exactly
    # (and in_channels // reduction = 8 is a valid bottleneck width).
    B, C, H, W, D = 2, 128, 16, 16, 16
    x = jax.random.normal(kx, (B, C, H, W, D), jnp.float32)
    params = init_params(kp, in_channels=C, reduction=16)

    out = jax.block_until_ready(scse_module_acs_forward(x, params))
    ref = jax.block_until_ready(scse_reference(x, params))

    assert out.shape == x.shape, f"shape mismatch: {out.shape} vs {x.shape}"
    assert bool(jnp.all(jnp.isfinite(out)))
    assert bool(jnp.allclose(out, ref, atol=1e-5, rtol=1e-5)), (
        f"max abs err {float(jnp.max(jnp.abs(out - ref)))}")
    print("KERNEL_OK")
</pallas_src>

<mosaic_0001>
module attributes {stable_mosaic.version = 11 : i64} {
  func.func @_pool_cse_kernel(%arg0: i32, %arg1: i32, %arg2: memref<1x128x1024xf32, #tpu.memory_space<vmem>>, %arg3: memref<8x128xf32, #tpu.memory_space<vmem>>, %arg4: memref<8x1xf32, #tpu.memory_space<vmem>>, %arg5: memref<128x8xf32, #tpu.memory_space<vmem>>, %arg6: memref<128x1xf32, #tpu.memory_space<vmem>>, %arg7: memref<1x128x1xf32, #tpu.memory_space<vmem>>, %arg8: memref<128x1xf32, #tpu.memory_space<vmem>>) attributes {dimension_semantics = [#tpu.dimension_semantics<parallel>, #tpu.dimension_semantics<arbitrary>], iteration_bounds = array<i64: 2, 4>, scalar_prefetch = 0 : i64, scratch_operands = 1 : i64, tpu.core_type = #tpu.core_type<tc>, window_params = [{transform_indices = @transform_0, window_bounds = array<i64: 1, 128, 1024>}, {pipeline_mode = #tpu.pipeline_mode<synchronous>, transform_indices = @transform_1, window_bounds = array<i64: 8, 128>}, {pipeline_mode = #tpu.pipeline_mode<synchronous>, transform_indices = @transform_2, window_bounds = array<i64: 8, 1>}, {pipeline_mode = #tpu.pipeline_mode<synchronous>, transform_indices = @transform_3, window_bounds = array<i64: 128, 8>}, {pipeline_mode = #tpu.pipeline_mode<synchronous>, transform_indices = @transform_4, window_bounds = array<i64: 128, 1>}, {transform_indices = @transform_5, window_bounds = array<i64: 1, 128, 1>}]} {
    %c0_i32 = arith.constant 0 : i32
    %0 = arith.cmpi eq, %arg1, %c0_i32 : i32
    %1 = arith.extui %0 : i1 to i32
    %c0_i32_0 = arith.constant 0 : i32
    %2 = arith.cmpi ne, %1, %c0_i32_0 : i32
    scf.if %2 {
      %cst_8 = arith.constant 0.000000e+00 : f32
      %13 = vector.broadcast %cst_8 : f32 to vector<128x1xf32>
      %c0_9 = arith.constant 0 : index
      %c0_10 = arith.constant 0 : index
      %14 = vector.load %arg8[%c0_9, %c0_10] : memref<128x1xf32, #tpu.memory_space<vmem>>, vector<128x1xf32>
      tpu.vector_store %arg8[%c0_9, %c0_10], %13 {strides = array<i32>} : memref<128x1xf32, #tpu.memory_space<vmem>>, vector<128x1xf32>,
    } else {
    }
    %c0 = arith.constant 0 : index
    %c0_1 = arith.constant 0 : index
    %c0_2 = arith.constant 0 : index
    %3 = vector.load %arg2[%c0, %c0_1, %c0_2] : memref<1x128x1024xf32, #tpu.memory_space<vmem>>, vector<1x128x1024xf32>
    %4 = vector.shape_cast %3 : vector<1x128x1024xf32> to vector<128x1024xf32>
    %c0_3 = arith.constant 0 : index
    %c0_4 = arith.constant 0 : index
    %5 = vector.load %arg8[%c0_3, %c0_4] : memref<128x1xf32, #tpu.memory_space<vmem>>, vector<128x1xf32>
    %cst = arith.constant dense<0.000000e+00> : vector<128xf32>
    %6 = vector.multi_reduction <add>, %4, %cst [1] : vector<128x1024xf32> to vector<128xf32>
    %7 = vector.shape_cast %6 : vector<128xf32> to vector<128x1xf32>
    %8 = arith.addf %5, %7 : vector<128x1xf32>
    %c0_5 = arith.constant 0 : index
    %c0_6 = arith.constant 0 : index
    %9 = vector.load %arg8[%c0_5, %c0_6] : memref<128x1xf32, #tpu.memory_space<vmem>>, vector<128x1xf32>
    tpu.vector_store %arg8[%c0_5, %c0_6], %8 {strides = array<i32>} : memref<128x1xf32, #tpu.memory_space<vmem>>, vector<128x1xf32>,
    %c3_i32 = arith.constant 3 : i32
    %10 = arith.cmpi eq, %arg1, %c3_i32 : i32
    %11 = arith.extui %10 : i1 to i32
    %c0_i32_7 = arith.constant 0 : i32
    %12 = arith.cmpi ne, %11, %c0_i32_7 : i32
    scf.if %12 {
      %c0_8 = arith.constant 0 : index
      %c0_9 = arith.constant 0 : index
      %13 = vector.load %arg8[%c0_8, %c0_9] : memref<128x1xf32, #tpu.memory_space<vmem>>, vector<128x1xf32>
      %cst_10 = arith.constant 2.44140625E-4 : f32
      %14 = vector.broadcast %cst_10 : f32 to vector<128x1xf32>
      %15 = arith.mulf %13, %14 : vector<128x1xf32>
      %c0_11 = arith.constant 0 : index
      %c0_12 = arith.constant 0 : index
      %16 = vector.load %arg3[%c0_11, %c0_12] : memref<8x128xf32, #tpu.memory_space<vmem>>, vector<8x128xf32>
      %cst_13 = arith.constant dense<0.000000e+00> : vector<8x1xf32>
      %17 = tpu.matmul %16, %15, %cst_13 {dimension_numbers = #tpu.dot_dimension_numbers<[1], [0], [0], [1], [0, 0, 1, 1], [], []>} : vector<8x128xf32>, vector<128x1xf32>, vector<8x1xf32> -> vector<8x1xf32>
      %c0_14 = arith.constant 0 : index
      %c0_15 = arith.constant 0 : index
      %18 = vector.load %arg4[%c0_14, %c0_15] : memref<8x1xf32, #tpu.memory_space<vmem>>, vector<8x1xf32>
      %19 = arith.addf %17, %18 : vector<8x1xf32>
      %cst_16 = arith.constant 0.000000e+00 : f32
      %20 = vector.broadcast %cst_16 : f32 to vector<8x1xf32>
      %21 = arith.maximumf %19, %20 : vector<8x1xf32>
      %c0_17 = arith.constant 0 : index
      %c0_18 = arith.constant 0 : index
      %22 = vector.load %arg5[%c0_17, %c0_18] : memref<128x8xf32, #tpu.memory_space<vmem>>, vector<128x8xf32>
      %cst_19 = arith.constant dense<0.000000e+00> : vector<128x1xf32>
      %23 = tpu.matmul %22, %21, %cst_19 {dimension_numbers = #tpu.dot_dimension_numbers<[1], [0], [0], [1], [0, 0, 1, 1], [], []>} : vector<128x8xf32>, vector<8x1xf32>, vector<128x1xf32> -> vector<128x1xf32>
      %c0_20 = arith.constant 0 : index
      %c0_21 = arith.constant 0 : index
      %24 = vector.load %arg6[%c0_20, %c0_21] : memref<128x1xf32, #tpu.memory_space<vmem>>, vector<128x1xf32>
      %25 = arith.addf %23, %24 : vector<128x1xf32>
      %26 = arith.negf %25 : vector<128x1xf32>
      %27 = math.exp %26 : vector<128x1xf32>
      %cst_22 = arith.constant 1.000000e+00 : f32
      %28 = vector.broadcast %cst_22 : f32 to vector<128x1xf32>
      %29 = arith.addf %28, %27 : vector<128x1xf32>
      %30 = arith.divf %28, %29 : vector<128x1xf32>
      %c0_23 = arith.constant 0 : index
      %c0_24 = arith.constant 0 : index
      %c0_25 = arith.constant 0 : index
      %31 = vector.load %arg7[%c0_23, %c0_24, %c0_25] : memref<1x128x1xf32, #tpu.memory_space<vmem>>, vector<1x128x1xf32>
      %32 = vector.shape_cast %31 : vector<1x128x1xf32> to vector<128x1xf32>
      %33 = vector.shape_cast %30 : vector<128x1xf32> to vector<1x128x1xf32>
      tpu.vector_store %arg7[%c0_23, %c0_24, %c0_25], %33 {strides = array<i32>} : memref<1x128x1xf32, #tpu.memory_space<vmem>>, vector<1x128x1xf32>,
    } else {
    }
    return
  }
  func.func @transform_0(%arg0: i32, %arg1: i32) -> (i32, i32, i32) {
    %c0_i32 = arith.constant 0 : i32
    %c0_i32_0 = arith.constant 0 : i32
    return %arg0, %c0_i32, %arg1 : i32, i32, i32
  }
  func.func @transform_1(%arg0: i32, %arg1: i32) -> (i32, i32) {
    %c0_i32 = arith.constant 0 : i32
    %c0_i32_0 = arith.constant 0 : i32
    %c0_i32_1 = arith.constant 0 : i32
    return %c0_i32, %c0_i32_0 : i32, i32
  }
  func.func @transform_2(%arg0: i32, %arg1: i32) -> (i32, i32) {
    %c0_i32 = arith.constant 0 : i32
    %c0_i32_0 = arith.constant 0 : i32
    %c0_i32_1 = arith.constant 0 : i32
    return %c0_i32, %c0_i32_0 : i32, i32
  }
  func.func @transform_3(%arg0: i32, %arg1: i32) -> (i32, i32) {
    %c0_i32 = arith.constant 0 : i32
    %c0_i32_0 = arith.constant 0 : i32
    %c0_i32_1 = arith.constant 0 : i32
    return %c0_i32, %c0_i32_0 : i32, i32
  }
  func.func @transform_4(%arg0: i32, %arg1: i32) -> (i32, i32) {
    %c0_i32 = arith.constant 0 : i32
    %c0_i32_0 = arith.constant 0 : i32
    %c0_i32_1 = arith.constant 0 : i32
    return %c0_i32, %c0_i32_0 : i32, i32
  }
  func.func @transform_5(%arg0: i32, %arg1: i32) -> (i32, i32, i32) {
    %c0_i32 = arith.constant 0 : i32
    %c0_i32_0 = arith.constant 0 : i32
    %c0_i32_1 = arith.constant 0 : i32
    return %arg0, %c0_i32, %c0_i32_0 : i32, i32, i32
  }
}

</mosaic_0001>

<bundles_post_ra>
// kernel: tpu_custom_call.1
= control target key start
LH: loop header
LB: loop body
LE: loop exit
PB: predicated region body
PF: predicated region fallthrough
CT: control target
= control target key end

     0   :  { %s2143_s0 = inlined_call_operand.hbm [shape: f32[2,128,4096], index: 0, kind: input, shape index: {}]   ;;  %s2144_s1 = inlined_call_operand.hbm [shape: f32[8,128], index: 1, kind: input, shape index: {}]   ;;  %s2145_s2 = inlined_call_operand.vmem [shape: f32[8,1], index: 2, kind: input, shape index: {}]   ;;  %s2146_s3 = inlined_call_operand.vmem [shape: f32[128,8], index: 3, kind: input, shape index: {}]   ;;  %s2147_s4 = inlined_call_operand.vmem [shape: f32[128,1], index: 4, kind: input, shape index: {}]   ;;  %s2148_s5 = inlined_call_operand.vmem [shape: f32[2,128,1], index: 5, kind: output, shape index: {}]  }
   0x1   :  { %2156 = sst [smem:[#allocation11_spill]] %s2144_s1 }
   0x2   :  { %10 = vsyncpa [#allocation4], 0 }
   0x3   :  { %12 = vsyncpa [#allocation4 + $0x1], 0 }
   0x4   :  { %13 = vsyncpa [#allocation6], 0  ;;  %s1647_s18 = smov 0   ;;  %s1649_s19 = smov 0  }
   0x5   :  { %s1651_s20 = smov 0   ;;  %s1653_s21 = smov 0  }
   0x6   :  { %s1655_s22 = smov 0   ;;  %s1657_s23 = smov 0  }
   0x7   :  { %s1659_s24 = smov 0   ;;  %s1661_s25 = smov 0  }
   0x8 LB: > { %2157 = sst [smem:[#allocation9_spill]] %s1598_s23  ;;  %s1155_s26 = sadd.s32 4294967295, %s1606_s25   ;;  %s1606_s25 = sphi %s1661_s25, %s19_s25   ;;  %s1602_s24 = sphi %s1659_s24, %s2176_s24   ;;  %s1598_s23 = sphi %s1657_s23, %s2171_s23   ;;  %s1594_s22 = sphi %s1655_s22, %s2175_s22   ;;  %s1590_s21 = sphi %s1653_s21, %s2170_s21   ;;  %s1586_s20 = sphi %s1651_s20, %s2174_s20   ;;  %s1582_s19 = sphi %s1649_s19, %s2173_s19   ;;  %s1578_s18 = sphi %s1647_s18, %s2172_s18  }
   0x9   : > { %p47_p0 = scmp.ne.s32.totalorder %s1586_s20, %s1582_s19  ;;  %p48_p1 = scmp.eq.s32.totalorder %s1606_s25, 0 }
   0xa   : > { %p53_p2 = scmp.ne.s32.totalorder %s1582_s19, %s1578_s18  ;;  %p1691_p3 = scmp.eq.s32.totalorder %s1155_s26, 0 }
   0xb   : > { %p49_p4 = por %p48_p1, %p47_p0  ;;  %p1157_p5 = scmp.ge.s32.totalorder %s1606_s25, 1 }
   0xc   : > { %s2158_s28 = scalar_select %p1691_p3, 1, 0 }
   0xd   : > { %p1698_p6 = por %p1691_p3, %p53_p2  ;;  %p174_p7 = scmp.lt.s32.totalorder %s1606_s25, 9 }
   0xe   : > { %s1608_s6 = smov [#allocation5]   ;;  %p1340_p10 = scmp.lt.s32.totalorder %s1606_s25, 8 }
   0xf   : > { %s2159_s29 = scalar_select %p1698_p6, 1, 0 }
  0x10   : > { %p1703_p8 = pnand %p1157_p5, %p174_p7  ;;  %s187_s7 = sshll.u32 %s1608_s6, 4  ;;  %s188_s7 = int_to_ptr.vmem [resolvable:$true] %s187_s7 }
  0x11   : > { %p1716_p12 = pnand %p1340_p10, %p49_p4  ;;  %s2163_s1 = sld [smem:[#allocation11_spill]] }
  0x12   : > { %s2160_s30 = scalar_select %p1703_p8, 1, 0 }
  0x13   : > { %p1331_p9 = pneg %p1703_p8 }
  0x14   : > { %s2162_s9 = scalar_select %p1716_p12, 1, 0 }
  0x15   : > { %p1712_p11 = pnand %p1331_p9, %p1691_p3 }
  0x17   : > { %s1478_s12 = scalar_lea.hbm %s2163_s1, 128  ;;  %p1480_p0 = pneg %p1712_p11 }
  0x18   : > { %p1479_p13 = scmp.ne.s32.totalorder %s2163_s1, %s1478_s12  ;;  %p1485_p5 = scmp.lt.u32.totalorder %s1478_s12, %s2163_s1 }
  0x1a   : > { %p1481_p1 = pnand %p1480_p0, %p1479_p13 }
  0x1c   : > { %p1482_p2 = pneg %p1481_p1 }
  0x1e   : > { %p1487_p4 = pnand %p1485_p5, %p1482_p2 }
  0x20   : > { %1490 = shalt.err (!%p1487_p4)
}
  0x21   : > { %s1491_s17 = scalar_lea.vmem %s188_s7, 128  ;;  %p1499_p3 = scmp.lt.s32.totalorder %s188_s7, %s188_s7 }
  0x22   : > { %p1492_p7 = scmp.ne.s32.totalorder %s188_s7, %s1491_s17  ;;  %p1500_p6 = scmp.lt.s32.totalorder %s1491_s17, %s1491_s17 }
  0x24   : > { %p1494_p9 = pnand %p1492_p7, %p1480_p0  ;;  %p1501_p8 = por %p1500_p6, %p1499_p3 }
  0x26   : > { %p1495_p10 = pneg %p1494_p9 }
  0x28   : > { %p1502_p12 = pnand %p1501_p8, %p1495_p10 }
  0x2a   : > { %1505 = shalt.err (!%p1502_p12)
}
  0x2b   : > { %1334 = dma.hbm_to_vmem [thread:$0]  (!%p1712_p11), %s2163_s1, 128, %s188_s7, [#allocation6]  }
  0x2c   : > { %s28_s6 = sadd.s32 1, %s1598_s23  ;;  %s31_s10 = sadd.s32 1, %s1602_s24 }
  0x2d   : > { %p29_p13 = scmp.ge.s32.totalorder %s28_s6, 4  ;;  %s207_s11 = sand.u32 1, %s1586_s20  }
  0x2e   : > { %s1160_s12 = sshll.u32 %s207_s11, 10  ;;  %s1161_s13 = sshll.u32 %s1598_s23, 3 }
  0x2f   : > { %s2178_s6 = smov (%p29_p13, %s28_s6), 0  ;;  %s2180_s10 = smov (!%p29_p13, %s31_s10), %s1602_s24 }
  0x30   : > { %2164 = sst [smem:[#allocation10_spill]] %s2178_s6  ;;  %s36_s8 = ssub.s32 %s1598_s23, %s2178_s6 }
  0x31   : > { %p33_p3 = scmp.ge.s32.totalorder %s2180_s10, 2  ;;  %s1162_s14 = sshll.u32 %s1602_s24, 9 }
  0x32   : > { %s211_s15 = scalar_lea.vmem [#allocation3], %s1160_s12  ;;  %s217_s16 = sadd.s32 %s1162_s14, %s1161_s13 }
  0x33   : > { %s220_s7 = sshll.u32 %s211_s15, 4  ;;  %s2182_s10 = smov (%p33_p3, %s2180_s10), 0  ;;  %s1748_s7 = int_to_ptr.vmem [resolvable:$true] %s220_s7 }
  0x34   : > { %s35_s17 = ssub.s32 %s1602_s24, %s2182_s10  ;;  %s1163_s18 = sshll.u32 %s217_s16, 7 }
  0x35   : > { %s37_s26 = sor.u32 %s36_s8, %s35_s17  ;;  %s1755_s6 = scalar_lea.hbm %s2143_s0, %s1163_s18 }
  0x36   : > { %p38_p6 = scmp.eq.s32.totalorder %s37_s26, 0  ;;  %s2165_s12 = sadd.s32 1, %s1586_s20 }
  0x37   : > { %s1762_s23 = scalar_lea.sflag [#allocation4], %s207_s11  ;;  %s1506_s13 = scalar_lea.hbm %s1755_s6, 16384 }
  0x38   : > { %s1760_s15 = scalar_select %p38_p6, %s1586_s20, %s2165_s12  }
  0x39   : > { %p1507_p8 = scmp.ne.s32.totalorder %s1755_s6, %s1506_s13  ;;  %p2166_p11 = scmp.ne.s32.totalorder %s2162_s9, 0 }
  0x3a   : > { %s1511_s8 = scalar_lea.hbm %s2143_s0, 131072  ;;  %p1512_p2 = scmp.lt.u32.totalorder %s1755_s6, %s2143_s0 }
  0x3b   : > { %p1508_p12 = pneg %p2166_p11  ;;  %p1513_p5 = scmp.lt.u32.totalorder %s1511_s8, %s1506_s13 }
  0x3c   : > { %p1515_p7 = scmp.lt.u32.totalorder %s1506_s13, %s1755_s6 }
  0x3d   : > { %p1509_p0 = pnand %p1508_p12, %p1507_p8  ;;  %p1514_p4 = por %p1513_p5, %p1512_p2 }
  0x3f   : > { %p1510_p1 = pneg %p1509_p0  ;;  %p1516_p9 = por %p1515_p7, %p1514_p4 }
  0x41   : > { %p1517_p10 = pnand %p1516_p9, %p1510_p1 }
  0x43   : > { %1520 = shalt.err (!%p1517_p10)
}
  0x44   : > { %s1521_s11 = scalar_lea.vmem %s1748_s7, 16384  ;;  %s1609_s17 = smov [#allocation3]  }
  0x45   : > { %p1522_p13 = scmp.ne.s32.totalorder %s1748_s7, %s1521_s11  ;;  %s1526_s18 = sshll.u32 %s1609_s17, 4  ;;  %s1527_s18 = int_to_ptr.vmem [resolvable:$false] %s1526_s18 }
  0x46   : > { %s1528_s26 = scalar_lea.vmem %s1527_s18, 32768  ;;  %p1529_p8 = scmp.lt.s32.totalorder %s1748_s7, %s1527_s18 }
  0x47   : > { %p1524_p3 = pnand %p1522_p13, %p1508_p12  ;;  %p1530_p0 = scmp.lt.s32.totalorder %s1528_s26, %s1521_s11 }
  0x49   : > { %p1525_p6 = pneg %p1524_p3  ;;  %p1531_p2 = por %p1530_p0, %p1529_p8 }
  0x4b   : > { %p1532_p5 = pnand %p1531_p2, %p1525_p6 }
  0x4d   : > { %1535 = shalt.err (!%p1532_p5)
}
  0x4e   : > { %s1610_s12 = smov 4096   ;;  %s1611_s13 = smov 1024  }
  0x4f   : > { %s1612_s1 = smov 64   ;;  %p2167_p12 = scmp.ne.s32.totalorder %s2160_s30, 0 }
  0x50   : > { %1338 = dma.hbm_to_vmem [thread:$0]  (!%p2166_p11), %s1755_s6, 16384, %s1748_s7, %s1762_s23, %s1610_s12, %s1611_s13, %s1612_s1  }
  0x51   : > { %232 = sbr.rel (%p2167_p12) target bundleno = 805 (0x325), region = 40  ;;  %s234_s27 = sand.u32 (!%p2167_p12), 1, %s1582_s19  }
  0x52   : > { %s1165_s8 = sshll.u32 (!%p2167_p12), %s234_s27, 10  ;;  %s235_s14 = scalar_lea.sflag (!%p2167_p12), [#allocation4], %s234_s27 }
  0x53   : > { %s1793_s16 = scalar_lea.vmem (!%p2167_p12), [#allocation3], %s1165_s8  ;;  %p2168_p1 = scmp.ne.s32.totalorder (!%p2167_p12), %s2159_s29, 0 }
  0x58   : > { %1569 = dma.done.wait (%p2168_p1), %s235_s14, 16384  }
  0x59   : > { %1571 = vsyncadd (%p2168_p1), %s235_s14, 4294950912  ;;  %p2169_p4 = scmp.ne.s32.totalorder %s2158_s28, 0 }
  0x5b   : > { %1573 = dma.done.wait (%p2169_p4), [#allocation6], 128  }
  0x5c   : > { %1575 = vsyncadd (%p2169_p4), [#allocation6], 4294967168  ;;  %p270_p11 = scmp.lt.s32.totalorder %s1594_s22, 1  ;;  %p1169_p7 = scmp.ne.s32.totalorder %s1590_s21, 0 }
  0x5d   : > { %vm279_vm0 = vcmask (!%p1169_p7), 7168   ;;  %v1613_v0 = vmov (!%p1169_p7), 0.0  }
  0x5e   : > { %s2184_s22 = smov (!%p270_p11, %s1594_s22), 1  ;;  %278 = sbr.rel (%p1169_p7) target bundleno = 103 (0x67), region = 52 }
  0x5f   : > { %s1205_s23 = sshll.u32 %s2184_s22, 7  ;;  %280 = vst.msk [vmem:[#allocation2] sm:$0xff] (!%p1169_p7), %vm279_vm0, %v1613_v0  ;;  %281 = vst.msk [vmem:[#allocation2 + $0x8] sm:$0xff] (!%p1169_p7), %vm279_vm0, %v1613_v0 }
  0x60   : > { %s1808_s6 = scalar_lea.vmem %s2148_s5, %s1205_s23  ;;  %282 = vst.msk [vmem:[#allocation2 + $0x10] sm:$0xff] (!%p1169_p7), %vm279_vm0, %v1613_v0  ;;  %283 = vst.msk [vmem:[#allocation2 + $0x18] sm:$0xff] (!%p1169_p7), %vm279_vm0, %v1613_v0 }
  0x61   : > { %284 = vst.msk [vmem:[#allocation2 + $0x20] sm:$0xff] (!%p1169_p7), %vm279_vm0, %v1613_v0  ;;  %285 = vst.msk [vmem:[#allocation2 + $0x28] sm:$0xff] (!%p1169_p7), %vm279_vm0, %v1613_v0 }
  0x62   : > { %286 = vst.msk [vmem:[#allocation2 + $0x30] sm:$0xff] (!%p1169_p7), %vm279_vm0, %v1613_v0  ;;  %287 = vst.msk [vmem:[#allocation2 + $0x38] sm:$0xff] (!%p1169_p7), %vm279_vm0, %v1613_v0 }
  0x63   : > { %288 = vst.msk [vmem:[#allocation2 + $0x40] sm:$0xff] (!%p1169_p7), %vm279_vm0, %v1613_v0  ;;  %289 = vst.msk [vmem:[#allocation2 + $0x48] sm:$0xff] (!%p1169_p7), %vm279_vm0, %v1613_v0 }
  0x64   : > { %290 = vst.msk [vmem:[#allocation2 + $0x50] sm:$0xff] (!%p1169_p7), %vm279_vm0, %v1613_v0  ;;  %291 = vst.msk [vmem:[#allocation2 + $0x58] sm:$0xff] (!%p1169_p7), %vm279_vm0, %v1613_v0 }
  0x65   : > { %292 = vst.msk [vmem:[#allocation2 + $0x60] sm:$0xff] %vm279_vm0, %v1613_v0  ;;  %293 = vst.msk [vmem:[#allocation2 + $0x68] sm:$0xff] %vm279_vm0, %v1613_v0 }
  0x66   : > { %294 = vst.msk [vmem:[#allocation2 + $0x70] sm:$0xff] %vm279_vm0, %v1613_v0  ;;  %295 = vst.msk [vmem:[#allocation2 + $0x78] sm:$0xff] %vm279_vm0, %v1613_v0 }
  0x67 PF: > { %v312_v1 = vld [vmem:[%s1793_s16 + $0x80] sm:$0xff]  ;;  %v313_v2 = vld [vmem:[%s1793_s16 + $0x88] sm:$0xff]  ;;  %v314_v3 = vld [vmem:[%s1793_s16 + $0x90] sm:$0xff]  ;;  %vm600_vm1 = vcmask 7168   ;;  %p1170_p9 = scmp.ne.s32.totalorder %s1590_s21, 3 }
  0x68   : > { %v458_v4 = vadd.f32 %v313_v2, %v312_v1  ;;  %v315_v5 = vld [vmem:[%s1793_s16 + $0x98] sm:$0xff]  ;;  %v296_v6 = vld [vmem:[%s1793_s16] sm:$0xff]  ;;  %v297_v8 = vld [vmem:[%s1793_s16 + $0x8] sm:$0xff]  ;;  %vm1615_vm2 = vmmov (!%p1170_p9), 0   ;;  %vm758_vm3 = vcmask (!%p1170_p9), 64512  }
  0x69   : > { %v298_v9 = vld [vmem:[%s1793_s16 + $0x10] sm:$0xff]  ;;  %v316_v10 = vld [vmem:[%s1793_s16 + $0xa0] sm:$0xff]  ;;  %v440_v11 = vadd.f32 %v297_v8, %v296_v6  ;;  %v299_v13 = vld [vmem:[%s1793_s16 + $0x18] sm:$0xff] }
  0x6a   : > { %v459_v7 = vadd.f32 %v458_v4, %v314_v3  ;;  %v320_v14 = vld [vmem:[%s1793_s16 + $0xc0] sm:$0xff]  ;;  %v321_v15 = vld [vmem:[%s1793_s16 + $0xc8] sm:$0xff]  ;;  %v322_v18 = vld [vmem:[%s1793_s16 + $0xd0] sm:$0xff] }
  0x6b   : > { %v317_v16 = vld [vmem:[%s1793_s16 + $0xa8] sm:$0xff]  ;;  %v441_v17 = vadd.f32 %v440_v11, %v298_v9  ;;  %v467_v19 = vadd.f32 %v321_v15, %v320_v14  ;;  %v318_v20 = vld [vmem:[%s1793_s16 + $0xb0] sm:$0xff]  ;;  %v300_v22 = vld [vmem:[%s1793_s16 + $0x20] sm:$0xff] }
  0x6c   : > { %v460_v12 = vadd.f32 %v459_v7, %v315_v5  ;;  %v323_v23 = vld [vmem:[%s1793_s16 + $0xd8] sm:$0xff]  ;;  %v304_v26 = vld [vmem:[%s1793_s16 + $0x40] sm:$0xff]  ;;  %v305_v27 = vld [vmem:[%s1793_s16 + $0x48] sm:$0xff] }
  0x6d   : > { %v442_v24 = vadd.f32 %v441_v17, %v299_v13  ;;  %v468_v25 = vadd.f32 %v467_v19, %v322_v18  ;;  %v306_v28 = vld [vmem:[%s1793_s16 + $0x50] sm:$0xff]  ;;  %v319_v29 = vld [vmem:[%s1793_s16 + $0xb8] sm:$0xff]  ;;  %v301_v31 = vld [vmem:[%s1793_s16 + $0x28] sm:$0xff]  ;;  %v449_v33 = vadd.f32 %v305_v27, %v304_v26 }
  0x6e   : > { %v461_v21 = vadd.f32 %v460_v12, %v316_v10  ;;  %v324_v32 = vld [vmem:[%s1793_s16 + $0xe0] sm:$0xff]  ;;  %v302_v34 = vld [vmem:[%s1793_s16 + $0x30] sm:$0xff]  ;;  %v307_v37 = vld [vmem:[%s1793_s16 + $0x58] sm:$0xff] }
  0x6f   : > { %v443_v35 = vadd.f32 %v442_v24, %v300_v22  ;;  %v469_v36 = vadd.f32 %v468_v25, %v323_v23  ;;  %v336_v38 = vld [vmem:[%s1793_s16 + $0x140] sm:$0xff]  ;;  %v325_v40 = vld [vmem:[%s1793_s16 + $0xe8] sm:$0xff]  ;;  %v450_v41 = vadd.f32 %v449_v33, %v306_v28  ;;  %v338_v43 = vld [vmem:[%s1793_s16 + $0x150] sm:$0xff] }
  0x70   : > { %v462_v30 = vadd.f32 %v461_v21, %v317_v16  ;;  %v337_v42 = vld [vmem:[%s1793_s16 + $0x148] sm:$0xff]  ;;  %v303_v44 = vld [vmem:[%s1793_s16 + $0x38] sm:$0xff]  ;;  %v326_v46 = vld [vmem:[%s1793_s16 + $0xf0] sm:$0xff] }
  0x71   : > { %v444_v45 = vadd.f32 %v443_v35, %v301_v31  ;;  %v470_v47 = vadd.f32 %v469_v36, %v324_v32  ;;  %v308_v48 = vld [vmem:[%s1793_s16 + $0x60] sm:$0xff]  ;;  %v485_v49 = vadd.f32 %v337_v42, %v336_v38  ;;  %v451_v51 = vadd.f32 %v450_v41, %v307_v37  ;;  %v339_v52 = vld [vmem:[%s1793_s16 + $0x158] sm:$0xff]  ;;  %v329_v54 = vld [vmem:[%s1793_s16 + $0x108] sm:$0xff] }
  0x72   : > { %v463_v39 = vadd.f32 %v462_v30, %v318_v20  ;;  %v328_v53 = vld [vmem:[%s1793_s16 + $0x100] sm:$0xff]  ;;  %v327_v56 = vld [vmem:[%s1793_s16 + $0xf8] sm:$0xff]  ;;  %v309_v58 = vld [vmem:[%s1793_s16 + $0x68] sm:$0xff] }
  0x73   : > { %v445_v55 = vadd.f32 %v444_v45, %v302_v34  ;;  %v471_v57 = vadd.f32 %v470_v47, %v325_v40  ;;  %v486_v59 = vadd.f32 %v485_v49, %v338_v43  ;;  %v330_v60 = vld [vmem:[%s1793_s16 + $0x110] sm:$0xff]  ;;  %v476_v61 = vadd.f32 %v329_v54, %v328_v53  ;;  %v340_v0 = vld [vmem:[%s1793_s16 + $0x160] sm:$0xff]  ;;  %v331_v1 = vld [vmem:[%s1793_s16 + $0x118] sm:$0xff] }
  0x74   : > { %v464_v50 = vadd.f32 %v463_v39, %v319_v29  ;;  %v310_v62 = vld [vmem:[%s1793_s16 + $0x70] sm:$0xff]  ;;  %v452_v63 = vadd.f32 %v451_v51, %v308_v48  ;;  %v352_v6 = vld [vmem:[%s1793_s16 + $0x1c0] sm:$0xff]  ;;  %v353_v7 = vld [vmem:[%s1793_s16 + $0x1c8] sm:$0xff] }
  0x75   : > { %v446_v2 = vadd.f32 %v445_v55, %v303_v44  ;;  %v472_v3 = vadd.f32 %v471_v57, %v326_v46  ;;  %v487_v4 = vadd.f32 %v486_v59, %v339_v52  ;;  %v477_v5 = vadd.f32 %v476_v61, %v330_v60  ;;  %v354_v8 = vld [vmem:[%s1793_s16 + $0x1d0] sm:$0xff]  ;;  %v311_v9 = vld [vmem:[%s1793_s16 + $0x78] sm:$0xff]  ;;  %v341_v11 = vld [vmem:[%s1793_s16 + $0x168] sm:$0xff] }
  0x76   : > { %465 = vadd.xlane.f32.xlu1 %v464_v50  ;;  %v453_v10 = vadd.f32 %v452_v63, %v309_v58  ;;  %v332_v12 = vld [vmem:[%s1793_s16 + $0x120] sm:$0xff]  ;;  %v503_v13 = vadd.f32 %v353_v7, %v352_v6  ;;  %v342_v15 = vld [vmem:[%s1793_s16 + $0x170] sm:$0xff]  ;;  %v355_v18 = vld [vmem:[%s1793_s16 + $0x1d8] sm:$0xff] }
  0x77   : > { %447 = vadd.xlane.f32.xlu0 %v446_v2  ;;  %v473_v14 = vadd.f32 %v472_v3, %v327_v56  ;;  %v488_v16 = vadd.f32 %v487_v4, %v340_v0  ;;  %v478_v17 = vadd.f32 %v477_v5, %v331_v1  ;;  %v344_v19 = vld [vmem:[%s1793_s16 + $0x180] sm:$0xff]  ;;  %v333_v21 = vld [vmem:[%s1793_s16 + $0x128] sm:$0xff]  ;;  %v346_v24 = vld [vmem:[%s1793_s16 + $0x190] sm:$0xff] }
  0x78   : > { %v454_v20 = vadd.f32 %v453_v10, %v310_v62  ;;  %v504_v22 = vadd.f32 %v503_v13, %v354_v8  ;;  %v345_v23 = vld [vmem:[%s1793_s16 + $0x188] sm:$0xff]  ;;  %v343_v25 = vld [vmem:[%s1793_s16 + $0x178] sm:$0xff]  ;;  %v334_v27 = vld [vmem:[%s1793_s16 + $0x130] sm:$0xff] }
  0x79   : > { %v489_v26 = vadd.f32 %v488_v16, %v341_v11  ;;  %v479_v28 = vadd.f32 %v478_v17, %v332_v12  ;;  %v356_v29 = vld [vmem:[%s1793_s16 + $0x1e0] sm:$0xff]  ;;  %v494_v30 = vadd.f32 %v345_v23, %v344_v19  ;;  %v347_v33 = vld [vmem:[%s1793_s16 + $0x198] sm:$0xff]  ;;  %v369_v35 = vld [vmem:[%s1793_s16 + $0x248] sm:$0xff] }
  0x7a   : > { %474 = vadd.xlane.f32.xlu1 %v473_v14  ;;  %v455_v31 = vadd.f32 %v454_v20, %v311_v9  ;;  %v505_v32 = vadd.f32 %v504_v22, %v355_v18  ;;  %v368_v34 = vld [vmem:[%s1793_s16 + $0x240] sm:$0xff]  ;;  %v335_v37 = vld [vmem:[%s1793_s16 + $0x138] sm:$0xff]  ;;  %v357_v39 = vld [vmem:[%s1793_s16 + $0x1e8] sm:$0xff] }
  0x7b   : > { %v490_v36 = vadd.f32 %v489_v26, %v342_v15  ;;  %v480_v38 = vadd.f32 %v479_v28, %v333_v21  ;;  %v495_v40 = vadd.f32 %v494_v30, %v346_v24  ;;  %v370_v41 = vld [vmem:[%s1793_s16 + $0x250] sm:$0xff]  ;;  %v521_v42 = vadd.f32 %v369_v35, %v368_v34  ;;  %v348_v45 = vld [vmem:[%s1793_s16 + $0x1a0] sm:$0xff]  ;;  %v371_v46 = vld [vmem:[%s1793_s16 + $0x258] sm:$0xff] }
  0x7c   : > { %456 = vadd.xlane.f32.xlu0 %v455_v31  ;;  %v358_v43 = vld [vmem:[%s1793_s16 + $0x1f0] sm:$0xff]  ;;  %v506_v44 = vadd.f32 %v505_v32, %v356_v29  ;;  %v360_v51 = vld [vmem:[%s1793_s16 + $0x200] sm:$0xff]  ;;  %v361_v52 = vld [vmem:[%s1793_s16 + $0x208] sm:$0xff] }
  0x7d   : > { %v491_v47 = vadd.f32 %v490_v36, %v343_v25  ;;  %v481_v48 = vadd.f32 %v480_v38, %v334_v27  ;;  %v496_v49 = vadd.f32 %v495_v40, %v347_v33  ;;  %v522_v50 = vadd.f32 %v521_v42, %v370_v41  ;;  %v362_v53 = vld [vmem:[%s1793_s16 + $0x210] sm:$0xff]  ;;  %v359_v54 = vld [vmem:[%s1793_s16 + $0x1f8] sm:$0xff]  ;;  %v349_v56 = vld [vmem:[%s1793_s16 + $0x1a8] sm:$0xff] }
  0x7e   : > { %v507_v55 = vadd.f32 %v506_v44, %v357_v39  ;;  %v372_v57 = vld [vmem:[%s1793_s16 + $0x260] sm:$0xff]  ;;  %v512_v58 = vadd.f32 %v361_v52, %v360_v51  ;;  %v350_v60 = vld [vmem:[%s1793_s16 + $0x1b0] sm:$0xff]  ;;  %v363_v63 = vld [vmem:[%s1793_s16 + $0x218] sm:$0xff] }
  0x7f   : > { %492 = vadd.xlane.f32.xlu1 %v491_v47  ;;  %v482_v59 = vadd.f32 %v481_v48, %v335_v37  ;;  %v497_v61 = vadd.f32 %v496_v49, %v348_v45  ;;  %v523_v62 = vadd.f32 %v522_v50, %v371_v46  ;;  %v384_v0 = vld [vmem:[%s1793_s16 + $0x2c0] sm:$0xff]  ;;  %v373_v2 = vld [vmem:[%s1793_s16 + $0x268] sm:$0xff]  ;;  %v386_v5 = vld [vmem:[%s1793_s16 + $0x2d0] sm:$0xff] }
  0x80   : > { %v508_v1 = vadd.f32 %v507_v55, %v358_v43  ;;  %v513_v3 = vadd.f32 %v512_v58, %v362_v53  ;;  %v385_v4 = vld [vmem:[%s1793_s16 + $0x2c8] sm:$0xff]  ;;  %v351_v6 = vld [vmem:[%s1793_s16 + $0x1b8] sm:$0xff]  ;;  %v374_v8 = vld [vmem:[%s1793_s16 + $0x270] sm:$0xff] }
  0x81   : > { %483 = vadd.xlane.f32.xlu0 %v482_v59  ;;  %v498_v7 = vadd.f32 %v497_v61, %v349_v56  ;;  %v524_v9 = vadd.f32 %v523_v62, %v372_v57  ;;  %v364_v10 = vld [vmem:[%s1793_s16 + $0x220] sm:$0xff]  ;;  %v539_v11 = vadd.f32 %v385_v4, %v384_v0  ;;  %v387_v14 = vld [vmem:[%s1793_s16 + $0x2d8] sm:$0xff]  ;;  %v377_v16 = vld [vmem:[%s1793_s16 + $0x288] sm:$0xff] }
  0x82   : > { %v509_v12 = vadd.f32 %v508_v1, %v359_v54  ;;  %v514_v13 = vadd.f32 %v513_v3, %v363_v63  ;;  %v376_v15 = vld [vmem:[%s1793_s16 + $0x280] sm:$0xff]  ;;  %v375_v18 = vld [vmem:[%s1793_s16 + $0x278] sm:$0xff]  ;;  %v365_v20 = vld [vmem:[%s1793_s16 + $0x228] sm:$0xff] }
  0x83   : > { %v499_v17 = vadd.f32 %v498_v7, %v350_v60  ;;  %v525_v19 = vadd.f32 %v524_v9, %v373_v2  ;;  %v540_v21 = vadd.f32 %v539_v11, %v386_v5  ;;  %v378_v22 = vld [vmem:[%s1793_s16 + $0x290] sm:$0xff]  ;;  %v530_v23 = vadd.f32 %v377_v16, %v376_v15  ;;  %v388_v26 = vld [vmem:[%s1793_s16 + $0x2e0] sm:$0xff]  ;;  %v379_v27 = vld [vmem:[%s1793_s16 + $0x298] sm:$0xff] }
  0x84   : > { %510 = vadd.xlane.f32.xlu1 %v509_v12  ;;  %v366_v24 = vld [vmem:[%s1793_s16 + $0x230] sm:$0xff]  ;;  %v515_v25 = vadd.f32 %v514_v13, %v364_v10  ;;  %v400_v32 = vld [vmem:[%s1793_s16 + $0x340] sm:$0xff]  ;;  %v401_v33 = vld [vmem:[%s1793_s16 + $0x348] sm:$0xff] }
  0x85   : > { %v500_v28 = vadd.f32 %v499_v17, %v351_v6  ;;  %v526_v29 = vadd.f32 %v525_v19, %v374_v8  ;;  %v541_v30 = vadd.f32 %v540_v21, %v387_v14  ;;  %v531_v31 = vadd.f32 %v530_v23, %v378_v22  ;;  %v402_v34 = vld [vmem:[%s1793_s16 + $0x350] sm:$0xff]  ;;  %v367_v35 = vld [vmem:[%s1793_s16 + $0x238] sm:$0xff]  ;;  %v389_v37 = vld [vmem:[%s1793_s16 + $0x2e8] sm:$0xff] }
  0x86   : > { %v516_v36 = vadd.f32 %v515_v25, %v365_v20  ;;  %v380_v38 = vld [vmem:[%s1793_s16 + $0x2a0] sm:$0xff]  ;;  %v557_v39 = vadd.f32 %v401_v33, %v400_v32  ;;  %v390_v41 = vld [vmem:[%s1793_s16 + $0x2f0] sm:$0xff]  ;;  %v403_v44 = vld [vmem:[%s1793_s16 + $0x358] sm:$0xff] }
  0x87   : > { %501 = vadd.xlane.f32.xlu0 %v500_v28  ;;  %v527_v40 = vadd.f32 %v526_v29, %v375_v18  ;;  %v542_v42 = vadd.f32 %v541_v30, %v388_v26  ;;  %v532_v43 = vadd.f32 %v531_v31, %v379_v27  ;;  %v392_v45 = vld [vmem:[%s1793_s16 + $0x300] sm:$0xff]  ;;  %v381_v47 = vld [vmem:[%s1793_s16 + $0x2a8] sm:$0xff]  ;;  %v394_v50 = vld [vmem:[%s1793_s16 + $0x310] sm:$0xff] }
  0x88   : > { %v517_v46 = vadd.f32 %v516_v36, %v366_v24  ;;  %v558_v48 = vadd.f32 %v557_v39, %v402_v34  ;;  %v393_v49 = vld [vmem:[%s1793_s16 + $0x308] sm:$0xff]  ;;  %v391_v51 = vld [vmem:[%s1793_s16 + $0x2f8] sm:$0xff]  ;;  %v382_v53 = vld [vmem:[%s1793_s16 + $0x2b0] sm:$0xff] }
  0x89   : > { %528 = vadd.xlane.f32.xlu1 %v527_v40  ;;  %v543_v52 = vadd.f32 %v542_v42, %v389_v37  ;;  %v533_v54 = vadd.f32 %v532_v43, %v380_v38  ;;  %v404_v55 = vld [vmem:[%s1793_s16 + $0x360] sm:$0xff]  ;;  %v548_v56 = vadd.f32 %v393_v49, %v392_v45  ;;  %v395_v59 = vld [vmem:[%s1793_s16 + $0x318] sm:$0xff]  ;;  %v417_v61 = vld [vmem:[%s1793_s16 + $0x3c8] sm:$0xff] }
  0x8a   : > { %v518_v57 = vadd.f32 %v517_v46, %v367_v35  ;;  %v559_v58 = vadd.f32 %v558_v48, %v403_v44  ;;  %v416_v60 = vld [vmem:[%s1793_s16 + $0x3c0] sm:$0xff]  ;;  %v383_v63 = vld [vmem:[%s1793_s16 + $0x2b8] sm:$0xff]  ;;  %v405_v1 = vld [vmem:[%s1793_s16 + $0x368] sm:$0xff] }
  0x8b   : > { %v544_v62 = vadd.f32 %v543_v52, %v390_v41  ;;  %v534_v0 = vadd.f32 %v533_v54, %v381_v47  ;;  %v549_v2 = vadd.f32 %v548_v56, %v394_v50  ;;  %v418_v3 = vld [vmem:[%s1793_s16 + $0x3d0] sm:$0xff]  ;;  %v575_v4 = vadd.f32 %v417_v61, %v416_v60  ;;  %v396_v7 = vld [vmem:[%s1793_s16 + $0x320] sm:$0xff]  ;;  %v419_v8 = vld [vmem:[%s1793_s16 + $0x3d8] sm:$0xff] }
  0x8c   : > { %519 = vadd.xlane.f32.xlu0 %v518_v57  ;;  %v406_v5 = vld [vmem:[%s1793_s16 + $0x370] sm:$0xff]  ;;  %v560_v6 = vadd.f32 %v559_v58, %v404_v55  ;;  %v408_v13 = vld [vmem:[%s1793_s16 + $0x380] sm:$0xff]  ;;  %v409_v14 = vld [vmem:[%s1793_s16 + $0x388] sm:$0xff] }
  0x8d   : > { %v545_v9 = vadd.f32 %v544_v62, %v391_v51  ;;  %v535_v10 = vadd.f32 %v534_v0, %v382_v53  ;;  %v550_v11 = vadd.f32 %v549_v2, %v395_v59  ;;  %v576_v12 = vadd.f32 %v575_v4, %v418_v3  ;;  %v410_v15 = vld [vmem:[%s1793_s16 + $0x390] sm:$0xff]  ;;  %v397_v17 = vld [vmem:[%s1793_s16 + $0x328] sm:$0xff]  ;;  %v420_v18 = vld [vmem:[%s1793_s16 + $0x3e0] sm:$0xff] }
  0x8e   : > { %v561_v16 = vadd.f32 %v560_v6, %v405_v1  ;;  %v566_v19 = vadd.f32 %v409_v14, %v408_v13  ;;  %v407_v21 = vld [vmem:[%s1793_s16 + $0x378] sm:$0xff]  ;;  %v398_v26 = vld [vmem:[%s1793_s16 + $0x330] sm:$0xff]  ;;  %v421_v27 = vld [vmem:[%s1793_s16 + $0x3e8] sm:$0xff] }
  0x8f   : > { %546 = vadd.xlane.f32.xlu1 %v545_v9  ;;  %v536_v20 = vadd.f32 %v535_v10, %v383_v63  ;;  %v551_v22 = vadd.f32 %v550_v11, %v396_v7  ;;  %v577_v23 = vadd.f32 %v576_v12, %v419_v8  ;;  %v411_v24 = vld [vmem:[%s1793_s16 + $0x398] sm:$0xff]  ;;  %v412_v31 = vld [vmem:[%s1793_s16 + $0x3a0] sm:$0xff]  ;;  %v422_v34 = vld [vmem:[%s1793_s16 + $0x3f0] sm:$0xff] }
  0x90   : > { %v562_v25 = vadd.f32 %v561_v16, %v406_v5  ;;  %v567_v28 = vadd.f32 %v566_v19, %v410_v15  ;;  %v399_v33 = vld [vmem:[%s1793_s16 + $0x338] sm:$0xff]  ;;  %v413_v38 = vld [vmem:[%s1793_s16 + $0x3a8] sm:$0xff]  ;;  %v414_v43 = vld [vmem:[%s1793_s16 + $0x3b0] sm:$0xff] }
  0x91   : > { %537 = vadd.xlane.f32.xlu0 %v536_v20  ;;  %v552_v29 = vadd.f32 %v551_v22, %v397_v17  ;;  %v578_v30 = vadd.f32 %v577_v23, %v420_v18  ;;  %v423_v39 = vld [vmem:[%s1793_s16 + $0x3f8] sm:$0xff]  ;;  %v426_v49 = vld [vmem:[#allocation2 + $0x10] sm:$0xff]  ;;  %v424_v52 = vld [vmem:[#allocation2] sm:$0xff] }
  0x92   : > { %v563_v32 = vadd.f32 %v562_v25, %v407_v21  ;;  %v568_v35 = vadd.f32 %v567_v28, %v411_v24  ;;  %v415_v46 = vld [vmem:[%s1793_s16 + $0x3b8] sm:$0xff]  ;;  %v425_v58 = vld [vmem:[#allocation2 + $0x8] sm:$0xff]  ;;  %v428_v63 = vld [vmem:[#allocation2 + $0x20] sm:$0xff] }
  0x93   : > { %v553_v36 = vadd.f32 %v552_v29, %v398_v26  ;;  %v579_v37 = vadd.f32 %v578_v30, %v421_v27  ;;  %v427_v54 = vld [vmem:[#allocation2 + $0x18] sm:$0xff]  ;;  %v429_v61 = vld [vmem:[#allocation2 + $0x28] sm:$0xff]  ;;  %v430_v6 = vld [vmem:[#allocation2 + $0x30] sm:$0xff] }
  0x94   : > { %564 = vadd.xlane.f32.xlu1 %v563_v32  ;;  %v569_v40 = vadd.f32 %v568_v35, %v412_v31  ;;  %v431_v3 = vld [vmem:[#allocation2 + $0x38] sm:$0xff]  ;;  %v433_v8 = vld [vmem:[#allocation2 + $0x48] sm:$0xff]  ;;  %v432_v12 = vld [vmem:[#allocation2 + $0x40] sm:$0xff] }
  0x95   : > { %v554_v41 = vadd.f32 %v553_v36, %v399_v33  ;;  %v580_v42 = vadd.f32 %v579_v37, %v422_v34  ;;  %v435_v15 = vld [vmem:[#allocation2 + $0x58] sm:$0xff]  ;;  %v434_v17 = vld [vmem:[#allocation2 + $0x50] sm:$0xff]  ;;  %v437_v21 = vld [vmem:[#allocation2 + $0x68] sm:$0xff]  ;;  %v1614_v36 = vmov (!%p1170_p9), 0.0|0.0  }
  0x96   : > { %v570_v44 = vadd.f32 %v569_v40, %v413_v38  ;;  %v436_v24 = vld [vmem:[#allocation2 + $0x60] sm:$0xff]  ;;  %v439_v26 = vld [vmem:[#allocation2 + $0x78] sm:$0xff]  ;;  %v438_v30 = vld [vmem:[#allocation2 + $0x70] sm:$0xff]  ;;  %1301 = vmatprep.subr.bf16.mxu0 (!%p1170_p9), %v1614_v36 }
  0x97   : > { %555 = vadd.xlane.f32.xlu0 %v554_v41  ;;  %v581_v45 = vadd.f32 %v580_v42, %v423_v39  ;;  %v1616_v41 = vmov (!%p1170_p9), 0.0  }
  0x98   : > { %v571_v47 = vadd.f32 %v570_v44, %v414_v43  ;;  %1272 = vmatprep.mubr.msk.f32.mxu0 (!%p1170_p9), %vm1615_vm2, %v1616_v41  ;;  %v744_v41 = vld [vmem:[%s2147_s4 + $0x10] sm:$0xff] (!%p1170_p9) }
  0x99   : > { %582 = vadd.xlane.f32.xlu1 %v581_v45 }
  0x9a   : > { %v572_v48 = vadd.f32 %v571_v47, %v415_v46 }
  0x9c   : > { %573 = vadd.xlane.f32.xlu0 %v572_v48 }
 0x103   : > { %v466_v50 = vpop.xlane.xlu1 %465 }
 0x104   : > { %v586_v51 = vadd.f32 %v466_v50, %v426_v49  ;;  %v448_v53 = vpop.xlane.xlu0 %447 }
 0x105   : > { %v584_v55 = vadd.f32 %v448_v53, %v424_v52 }
 0x106   : > { %603 = vst.msk [vmem:[#allocation2 + $0x10] sm:$0xff] %vm600_vm1, %v586_v51 }
 0x107   : > { %v475_v56 = vpop.xlane.xlu1 %474  ;;  %601 = vst.msk [vmem:[#allocation2] sm:$0xff] %vm600_vm1, %v584_v55 }
 0x108   : > { %v587_v57 = vadd.f32 %v475_v56, %v427_v54 }
 0x109   : > { %v457_v59 = vpop.xlane.xlu0 %456 }
 0x10a   : > { %604 = vst.msk [vmem:[#allocation2 + $0x18] sm:$0xff] %vm600_vm1, %v587_v57  ;;  %v585_v60 = vadd.f32 %v457_v59, %v425_v58 }
 0x10c   : > { %602 = vst.msk [vmem:[#allocation2 + $0x8] sm:$0xff] %vm600_vm1, %v585_v60  ;;  %v493_v62 = vpop.xlane.xlu1 %492 }
 0x10d   : > { %v589_v0 = vadd.f32 %v493_v62, %v429_v61  ;;  %v623_v35 = vld [vmem:[#allocation2 + $0x10] sm:$0xff] (!%p1170_p9) }
 0x10e   : > { %v484_v1 = vpop.xlane.xlu0 %483  ;;  %v621_v33 = vld [vmem:[#allocation2] sm:$0xff] (!%p1170_p9)  ;;  %v639_v40 = vmul.f32 (!%p1170_p9), 0.00024414063, %v623_v35 }
 0x10f   : > { %606 = vst.msk [vmem:[#allocation2 + $0x28] sm:$0xff] %vm600_vm1, %v589_v0  ;;  %v588_v2 = vadd.f32 %v484_v1, %v428_v63  ;;  %v637_v37 = vmul.f32 (!%p1170_p9), 0.00024414063, %v621_v33  ;;  %v743_v33 = vld [vmem:[%s2147_s4 + $0x8] sm:$0xff] (!%p1170_p9) }
 0x111   : > { %605 = vst.msk [vmem:[#allocation2 + $0x20] sm:$0xff] %vm600_vm1, %v588_v2  ;;  %v511_v4 = vpop.xlane.xlu1 %510  ;;  %v624_v39 = vld [vmem:[#allocation2 + $0x18] sm:$0xff] (!%p1170_p9) }
 0x112   : > { %v591_v5 = vadd.f32 %v511_v4, %v431_v3  ;;  %v640_v42 = vmul.f32 (!%p1170_p9), 0.00024414063, %v624_v39  ;;  %v745_v39 = vld [vmem:[%s2147_s4 + $0x18] sm:$0xff] (!%p1170_p9) }
 0x113   : > { %v622_v34 = vld [vmem:[#allocation2 + $0x8] sm:$0xff] (!%p1170_p9) }
 0x114   : > { %608 = vst.msk [vmem:[#allocation2 + $0x38] sm:$0xff] %vm600_vm1, %v591_v5  ;;  %v502_v7 = vpop.xlane.xlu0 %501  ;;  %v638_v38 = vmul.f32 (!%p1170_p9), 0.00024414063, %v622_v34  ;;  %v1305_v46 = vpack.c.bf16 (!%p1170_p9), %v640_v42, %v639_v40  ;;  %v742_v34 = vld [vmem:[%s2147_s4] sm:$0xff] (!%p1170_p9) }
 0x115   : > { %v590_v9 = vadd.f32 %v502_v7, %v430_v6 }
 0x116   : > { %v529_v10 = vpop.xlane.xlu1 %528  ;;  %v626_v44 = vld [vmem:[#allocation2 + $0x28] sm:$0xff] (!%p1170_p9)  ;;  %v1302_v45 = vpack.c.bf16 (!%p1170_p9), %v638_v38, %v637_v37 }
 0x117   : > { %607 = vst.msk [vmem:[#allocation2 + $0x30] sm:$0xff] %vm600_vm1, %v590_v9  ;;  %v593_v11 = vadd.f32 %v529_v10, %v433_v8  ;;  %v642_v48 = vmul.f32 (!%p1170_p9), 0.00024414063, %v626_v44 }
 0x118   : > { %v625_v43 = vld [vmem:[#allocation2 + $0x20] sm:$0xff] (!%p1170_p9)  ;;  %1303 = vmatpush3.bf16.msra.mxu0 (!%p1170_p9), %v1302_v45 }
 0x119   : > { %610 = vst.msk [vmem:[#allocation2 + $0x48] sm:$0xff] %vm600_vm1, %v593_v11  ;;  %v520_v13 = vpop.xlane.xlu0 %519  ;;  %v641_v47 = vmul.f32 (!%p1170_p9), 0.00024414063, %v625_v43  ;;  %1304 = vmatprep.subr.bf16.mxu0 (!%p1170_p9), %v1614_v36  ;;  %v653_v11 = vld [vmem:[#allocation5] sm:$0xff] (!%p1170_p9) }
 0x11a   : > { %v592_v14 = vadd.f32 %v520_v13, %v432_v12  ;;  %v726_v12 = vld [vmem:[%s2146_s3] sm:$0xff] (!%p1170_p9) }
 0x11b   : > { %v628_v50 = vld [vmem:[#allocation2 + $0x38] sm:$0xff] (!%p1170_p9)  ;;  %v1308_v51 = vpack.c.bf16 (!%p1170_p9), %v642_v48, %v641_v47  ;;  %1277 = vmatprep.mubr.msk.f32.mxu1 (!%p1170_p9), %vm758_vm3, %v726_v12  ;;  %v654_v13 = vld [vmem:[%s2145_s2] sm:$0xff] (!%p1170_p9)  ;;  %v747_v47 = vld [vmem:[%s2147_s4 + $0x28] sm:$0xff] (!%p1170_p9) }
 0x11c   : > { %609 = vst.msk [vmem:[#allocation2 + $0x40] sm:$0xff] %vm600_vm1, %v592_v14  ;;  %v547_v16 = vpop.xlane.xlu1 %546  ;;  %1306 = vmatpush3.bf16.msra.mxu0 (!%p1170_p9), %v1305_v46  ;;  %v644_v53 = vmul.f32 (!%p1170_p9), 0.00024414063, %v628_v50 }
 0x11d   : > { %v595_v18 = vadd.f32 %v547_v16, %v435_v15  ;;  %1307 = vmatprep.subr.bf16.mxu0 (!%p1170_p9), %v1614_v36 }
 0x11e   : > { %v538_v19 = vpop.xlane.xlu0 %537  ;;  %v627_v49 = vld [vmem:[#allocation2 + $0x30] sm:$0xff] (!%p1170_p9) }
 0x11f   : > { %612 = vst.msk [vmem:[#allocation2 + $0x58] sm:$0xff] %vm600_vm1, %v595_v18  ;;  %v594_v20 = vadd.f32 %v538_v19, %v434_v17  ;;  %v643_v52 = vmul.f32 (!%p1170_p9), 0.00024414063, %v627_v49  ;;  %v727_v18 = vld [vmem:[%s2146_s3 + $0x8] sm:$0xff] (!%p1170_p9)  ;;  %v728_v19 = vld [vmem:[%s2146_s3 + $0x10] sm:$0xff] (!%p1170_p9)  ;;  %v746_v49 = vld [vmem:[%s2147_s4 + $0x20] sm:$0xff] (!%p1170_p9) }
 0x120   : > { %v630_v55 = vld [vmem:[#allocation2 + $0x48] sm:$0xff] (!%p1170_p9)  ;;  %1309 = vmatpush3.bf16.msra.mxu0 (!%p1170_p9), %v1308_v51 }
 0x121   : > { %611 = vst.msk [vmem:[#allocation2 + $0x50] sm:$0xff] %vm600_vm1, %v594_v20  ;;  %v565_v22 = vpop.xlane.xlu1 %564  ;;  %v1311_v56 = vpack.c.bf16 (!%p1170_p9), %v644_v53, %v643_v52  ;;  %v646_v58 = vmul.f32 (!%p1170_p9), 0.00024414063, %v630_v55  ;;  %1310 = vmatprep.subr.bf16.mxu0 (!%p1170_p9), %v1614_v36  ;;  %v729_v20 = vld [vmem:[%s2146_s3 + $0x18] sm:$0xff] (!%p1170_p9) }
 0x122   : > { %v597_v23 = vadd.f32 %v565_v22, %v437_v21  ;;  %v730_v21 = vld [vmem:[%s2146_s3 + $0x20] sm:$0xff] (!%p1170_p9)  ;;  %v731_v22 = vld [vmem:[%s2146_s3 + $0x28] sm:$0xff] (!%p1170_p9)  ;;  %v749_v55 = vld [vmem:[%s2147_s4 + $0x38] sm:$0xff] (!%p1170_p9) }
 0x123   : > { %v629_v54 = vld [vmem:[#allocation2 + $0x40] sm:$0xff] (!%p1170_p9) }
 0x124   : > { %614 = vst.msk [vmem:[#allocation2 + $0x68] sm:$0xff] %vm600_vm1, %v597_v23  ;;  %v556_v25 = vpop.xlane.xlu0 %555  ;;  %v645_v57 = vmul.f32 (!%p1170_p9), 0.00024414063, %v629_v54  ;;  %1312 = vmatpush3.bf16.msra.mxu0 (!%p1170_p9), %v1311_v56  ;;  %v732_v23 = vld [vmem:[%s2146_s3 + $0x30] sm:$0xff] (!%p1170_p9) }
 0x125   : > { %v596_v27 = vadd.f32 %v556_v25, %v436_v24  ;;  %1313 = vmatprep.subr.bf16.mxu0 (!%p1170_p9), %v1614_v36  ;;  %v733_v24 = vld [vmem:[%s2146_s3 + $0x38] sm:$0xff] (!%p1170_p9)  ;;  %v734_v25 = vld [vmem:[%s2146_s3 + $0x40] sm:$0xff] (!%p1170_p9) }
 0x126   : > { %v583_v28 = vpop.xlane.xlu1 %582  ;;  %620 = sbr.rel (%p1170_p9) target bundleno = 805 (0x325), region = 56  ;;  %v632_v60 = vld [vmem:[#allocation2 + $0x58] sm:$0xff] (!%p1170_p9)  ;;  %v1314_v61 = vpack.c.bf16 (!%p1170_p9), %v646_v58, %v645_v57  ;;  %v748_v57 = vld [vmem:[%s2147_s4 + $0x30] sm:$0xff] (!%p1170_p9) }
 0x127   : > { %613 = vst.msk [vmem:[#allocation2 + $0x60] sm:$0xff] %vm600_vm1, %v596_v27  ;;  %v599_v29 = vadd.f32 %v583_v28, %v439_v26  ;;  %v648_v63 = vmul.f32 (!%p1170_p9), 0.00024414063, %v632_v60  ;;  %v735_v26 = vld [vmem:[%s2146_s3 + $0x48] sm:$0xff] (!%p1170_p9)  ;;  %v736_v27 = vld [vmem:[%s2146_s3 + $0x50] sm:$0xff] (!%p1170_p9)  ;;  %v737_v28 = vld [vmem:[%s2146_s3 + $0x58] sm:$0xff] (!%p1170_p9) }
 0x128   : > { %v631_v59 = vld [vmem:[#allocation2 + $0x50] sm:$0xff] (!%p1170_p9)  ;;  %1315 = vmatpush3.bf16.msra.mxu0 (!%p1170_p9), %v1314_v61 }
 0x129   : > { %616 = vst.msk [vmem:[#allocation2 + $0x78] sm:$0xff] %vm600_vm1, %v599_v29  ;;  %v574_v31 = vpop.xlane.xlu0 %573  ;;  %v647_v62 = vmul.f32 (!%p1170_p9), 0.00024414063, %v631_v59  ;;  %1316 = vmatprep.subr.bf16.mxu0 (!%p1170_p9), %v1614_v36  ;;  %v738_v29 = vld [vmem:[%s2146_s3 + $0x60] sm:$0xff] (!%p1170_p9) }
 0x12a   : > { %v598_v32 = vadd.f32 %v574_v31, %v438_v30  ;;  %v739_v30 = vld [vmem:[%s2146_s3 + $0x68] sm:$0xff] (!%p1170_p9)  ;;  %v740_v31 = vld [vmem:[%s2146_s3 + $0x70] sm:$0xff] (!%p1170_p9) }
 0x12b   : > { %v634_v1 = vld [vmem:[#allocation2 + $0x68] sm:$0xff] (!%p1170_p9)  ;;  %v1317_v2 = vpack.c.bf16 (!%p1170_p9), %v648_v63, %v647_v62 }
 0x12c   : > { %615 = vst.msk [vmem:[#allocation2 + $0x70] sm:$0xff] %vm600_vm1, %v598_v32  ;;  %v650_v4 = vmul.f32 (!%p1170_p9), 0.00024414063, %v634_v1  ;;  %v741_v32 = vld [vmem:[%s2146_s3 + $0x78] sm:$0xff] (!%p1170_p9)  ;;  %v751_v63 = vld [vmem:[%s2147_s4 + $0x48] sm:$0xff] (!%p1170_p9) }
 0x12d   : > { %1318 = vmatpush3.bf16.msra.mxu0 %v1317_v2  ;;  %v750_v2 = vld [vmem:[%s2147_s4 + $0x40] sm:$0xff] }
 0x12e   : > { %v633_v0 = vld [vmem:[#allocation2 + $0x60] sm:$0xff]  ;;  %1319 = vmatprep.subr.bf16.mxu0 %v1614_v36 }
 0x12f   : > { %v649_v3 = vmul.f32 0.00024414063, %v633_v0 }
 0x130   : > { %v636_v6 = vld [vmem:[#allocation2 + $0x78] sm:$0xff] }
 0x131   : > { %v1320_v7 = vpack.c.bf16 %v650_v4, %v649_v3  ;;  %v652_v9 = vmul.f32 0.00024414063, %v636_v6 }
 0x133   : > { %v635_v5 = vld [vmem:[#allocation2 + $0x70] sm:$0xff]  ;;  %1321 = vmatpush3.bf16.msra.mxu0 %v1320_v7 }
 0x134   : > { %v651_v8 = vmul.f32 0.00024414063, %v635_v5  ;;  %1322 = vmatprep.subr.bf16.mxu0 %v1614_v36 }
 0x136   : > { %v1323_v10 = vpack.c.bf16 %v652_v9, %v651_v8 }
 0x138   : > { %1324 = vmatpush3.bf16.msra.mxu0 %v1323_v10 }
 0x13b   : > { %1273 = vmatmul.mubr.f32.vlgmr.msra.gmra.mrb[0].mxu0 %v653_v11  ;;  %v753_v11 = vld [vmem:[%s2147_s4 + $0x58] sm:$0xff] }
 0x20e   : > { %v721_v14 = vpop.f32.mrb[0].mxu0 }
 0x20f   : > { %v722_v15 = vadd.f32 %v721_v14, %v654_v13  ;;  %v1274_v16 = vpop.f32.mrb[1].mxu0  ;;  %v752_v14 = vld [vmem:[%s2147_s4 + $0x50] sm:$0xff] }
 0x211   : > { %v725_v17 = vmax.f32 %v722_v15, 0.0 }
 0x213   : > { %1275 = vmatprep.subr.mxu1 %v725_v17 }
 0x214   : > { %1276 = vmatpush3.msra.mxu1 %v725_v17 }
 0x215   : > { %1278 = vmatmul.mubr.msk.f32.vlgmr.msra.gmra.mrb[0].mxu1 %vm758_vm3, %v727_v18 }
 0x216   : > { %1280 = vmatprep.mubr.msk.f32.mxu1 %vm758_vm3, %v728_v19 }
 0x219   : > { %1281 = vmatmul.mubr.msk.f32.gmra.mrb[2].mxu1 %vm758_vm3, %v729_v20 }
 0x21a   : > { %1283 = vmatprep.mubr.msk.f32.mxu1 %vm758_vm3, %v730_v21 }
 0x21d   : > { %1284 = vmatmul.mubr.msk.f32.gmra.mrb[4].mxu1 %vm758_vm3, %v731_v22 }
 0x21e   : > { %1286 = vmatprep.mubr.msk.f32.mxu1 %vm758_vm3, %v732_v23  ;;  %v755_v23 = vld [vmem:[%s2147_s4 + $0x68] sm:$0xff] }
 0x221   : > { %1287 = vmatmul.mubr.msk.f32.gmra.mrb[6].mxu1 %vm758_vm3, %v733_v24 }
 0x222   : > { %1289 = vmatprep.mubr.msk.f32.mxu1 %vm758_vm3, %v734_v25 }
 0x225   : > { %1290 = vmatmul.mubr.msk.f32.gmra.mrb[8].mxu1 %vm758_vm3, %v735_v26  ;;  %v754_v26 = vld [vmem:[%s2147_s4 + $0x60] sm:$0xff] }
 0x226   : > { %1292 = vmatprep.mubr.msk.f32.mxu1 %vm758_vm3, %v736_v27 }
 0x229   : > { %1293 = vmatmul.mubr.msk.f32.gmra.mrb[10].mxu1 %vm758_vm3, %v737_v28 }
 0x22a   : > { %1295 = vmatprep.mubr.msk.f32.mxu1 %vm758_vm3, %v738_v29 }
 0x22d   : > { %1296 = vmatmul.mubr.msk.f32.gmra.mrb[12].mxu1 %vm758_vm3, %v739_v30 }
 0x22e   : > { %1298 = vmatprep.mubr.msk.f32.mxu1 %vm758_vm3, %v740_v31 }
 0x231   : > { %1299 = vmatmul.mubr.msk.f32.gmra.mrb[14].mxu1 %vm758_vm3, %v741_v32 }
 0x2e8   : > { %v1279_v35 = vpop.f32.mrb[0].mxu1 }
 0x2e9   : > { %v879_v36 = vadd.f32 %v1279_v35, %v743_v33  ;;  %v873_v37 = vpop.f32.mrb[1].mxu1  ;;  %v757_v35 = vld [vmem:[%s2147_s4 + $0x78] sm:$0xff] }
 0x2ea   : > { %v874_v38 = vadd.f32 %v873_v37, %v742_v34 }
 0x2eb   : > { %v1188_v40 = vmul.f32 -1.442695, %v879_v36 }
 0x2ec   : > { %v1187_v42 = vmul.f32 -1.442695, %v874_v38  ;;  %v1282_v43 = vpop.f32.mrb[2].mxu1  ;;  %v756_v38 = vld [vmem:[%s2147_s4 + $0x70] sm:$0xff] }
 0x2ed   : > { %1414 = vpow2.f32 %v1188_v40  ;;  %v889_v44 = vadd.f32 %v1282_v43, %v745_v39  ;;  %v883_v45 = vpop.f32.mrb[3].mxu1 }
 0x2ee   : > { %1416 = vpow2.f32 %v1187_v42  ;;  %v884_v46 = vadd.f32 %v883_v45, %v744_v41 }
 0x2ef   : > { %v1190_v48 = vmul.f32 -1.442695, %v889_v44 }
 0x2f0   : > { %v1189_v50 = vmul.f32 -1.442695, %v884_v46  ;;  %v1285_v51 = vpop.f32.mrb[4].mxu1 }
 0x2f1   : > { %1418 = vpow2.f32 %v1190_v48  ;;  %v899_v52 = vadd.f32 %v1285_v51, %v747_v47  ;;  %v893_v53 = vpop.f32.mrb[5].mxu1 }
 0x2f2   : > { %1420 = vpow2.f32 %v1189_v50  ;;  %v894_v54 = vadd.f32 %v893_v53, %v746_v49 }
 0x2f3   : > { %v1192_v56 = vmul.f32 -1.442695, %v899_v52 }
 0x2f4   : > { %v1191_v58 = vmul.f32 -1.442695, %v894_v54  ;;  %v1288_v59 = vpop.f32.mrb[6].mxu1 }
 0x2f5   : > { %1422 = vpow2.f32 %v1192_v56  ;;  %v909_v60 = vadd.f32 %v1288_v59, %v749_v55  ;;  %v903_v61 = vpop.f32.mrb[7].mxu1 }
 0x2f6   : > { %1424 = vpow2.f32 %v1191_v58  ;;  %v904_v62 = vadd.f32 %v903_v61, %v748_v57 }
 0x2f7   : > { %v1415_v0 = vpop.eup %1414  ;;  %v1194_v1 = vmul.f32 -1.442695, %v909_v60 }
 0x2f8   : > { %v1417_v3 = vpop.eup %1416  ;;  %v1001_v4 = vadd.f32 1.0, %v1415_v0  ;;  %v1193_v5 = vmul.f32 -1.442695, %v904_v62  ;;  %v1291_v6 = vpop.f32.mrb[8].mxu1 }
 0x2f9   : > { %v1000_v7 = vadd.f32 1.0, %v1417_v3  ;;  %1426 = vpow2.f32 %v1194_v1  ;;  %v919_v8 = vadd.f32 %v1291_v6, %v751_v63  ;;  %v913_v9 = vpop.f32.mrb[9].mxu1 }
 0x2fa   : > { %1428 = vrcp.f32 %v1001_v4  ;;  %v914_v10 = vadd.f32 %v913_v9, %v750_v2 }
 0x2fb   : > { %v1419_v12 = vpop.eup %1418  ;;  %1430 = vrcp.f32 %v1000_v7  ;;  %v1196_v13 = vmul.f32 -1.442695, %v919_v8 }
 0x2fc   : > { %v1421_v15 = vpop.eup %1420  ;;  %v1003_v16 = vadd.f32 1.0, %v1419_v12  ;;  %1432 = vpow2.f32 %v1193_v5  ;;  %v1195_v17 = vmul.f32 -1.442695, %v914_v10  ;;  %v1294_v18 = vpop.f32.mrb[10].mxu1 }
 0x2fd   : > { %v1002_v19 = vadd.f32 1.0, %v1421_v15  ;;  %1434 = vpow2.f32 %v1196_v13  ;;  %v929_v20 = vadd.f32 %v1294_v18, %v753_v11  ;;  %v923_v21 = vpop.f32.mrb[11].mxu1 }
 0x2fe   : > { %1436 = vrcp.f32 %v1003_v16  ;;  %v924_v22 = vadd.f32 %v923_v21, %v752_v14 }
 0x2ff   : > { %v1423_v24 = vpop.eup %1422  ;;  %1438 = vrcp.f32 %v1002_v19  ;;  %v1198_v25 = vmul.f32 -1.442695, %v929_v20 }
 0x300   : > { %v1425_v27 = vpop.eup %1424  ;;  %v1005_v28 = vadd.f32 1.0, %v1423_v24  ;;  %1440 = vpow2.f32 %v1195_v17  ;;  %v1197_v29 = vmul.f32 -1.442695, %v924_v22  ;;  %v1297_v30 = vpop.f32.mrb[12].mxu1 }
 0x301   : > { %v1004_v31 = vadd.f32 1.0, %v1425_v27  ;;  %1442 = vpow2.f32 %v1198_v25  ;;  %v939_v32 = vadd.f32 %v1297_v30, %v755_v23  ;;  %v933_v33 = vpop.f32.mrb[13].mxu1 }
 0x302   : > { %1444 = vrcp.f32 %v1005_v28  ;;  %v934_v34 = vadd.f32 %v933_v33, %v754_v26 }
 0x303   : > { %v1427_v36 = vpop.eup %1426  ;;  %1446 = vrcp.f32 %v1004_v31  ;;  %v1200_v37 = vmul.f32 -1.442695, %v939_v32 }
 0x304   : > { %v1429_v39 = vpop.eup %1428  ;;  %v1007_v40 = vadd.f32 1.0, %v1427_v36  ;;  %1448 = vpow2.f32 %v1197_v29  ;;  %v1199_v41 = vmul.f32 -1.442695, %v934_v34  ;;  %v1300_v42 = vpop.f32.mrb[14].mxu1 }
 0x305   : > { %v1431_v43 = vpop.eup %1430  ;;  %1049 = vst.msk [vmem:[%s1808_s6 + $0x8] sm:$0xff] %vm600_vm1, %v1429_v39  ;;  %1450 = vpow2.f32 %v1200_v37  ;;  %v949_v44 = vadd.f32 %v1300_v42, %v757_v35  ;;  %v943_v45 = vpop.f32.mrb[15].mxu1 }
 0x306   : > { %v1433_v46 = vpop.eup %1432  ;;  %1048 = vst.msk [vmem:[%s1808_s6] sm:$0xff] %vm600_vm1, %v1431_v43  ;;  %1452 = vrcp.f32 %v1007_v40  ;;  %v944_v47 = vadd.f32 %v943_v45, %v756_v38 }
 0x307   : > { %v1435_v48 = vpop.eup %1434  ;;  %v1006_v49 = vadd.f32 1.0, %v1433_v46  ;;  %1454 = vpow2.f32 %v1199_v41  ;;  %v1202_v50 = vmul.f32 -1.442695, %v949_v44 }
 0x308   : > { %v1437_v51 = vpop.eup %1436  ;;  %v1009_v52 = vadd.f32 1.0, %v1435_v48  ;;  %v1201_v53 = vmul.f32 -1.442695, %v944_v47 }
 0x309   : > { %v1439_v54 = vpop.eup %1438  ;;  %1051 = vst.msk [vmem:[%s1808_s6 + $0x18] sm:$0xff] %vm600_vm1, %v1437_v51  ;;  %1456 = vrcp.f32 %v1006_v49 }
 0x30a   : > { %v1441_v55 = vpop.eup %1440  ;;  %1050 = vst.msk [vmem:[%s1808_s6 + $0x10] sm:$0xff] %vm600_vm1, %v1439_v54  ;;  %1458 = vrcp.f32 %v1009_v52 }
 0x30b   : > { %v1443_v56 = vpop.eup %1442  ;;  %v1008_v57 = vadd.f32 1.0, %v1441_v55  ;;  %1460 = vpow2.f32 %v1202_v50 }
 0x30c   : > { %v1445_v58 = vpop.eup %1444  ;;  %v1011_v59 = vadd.f32 1.0, %v1443_v56  ;;  %1462 = vpow2.f32 %v1201_v53 }
 0x30d   : > { %v1447_v60 = vpop.eup %1446  ;;  %1053 = vst.msk [vmem:[%s1808_s6 + $0x28] sm:$0xff] %vm600_vm1, %v1445_v58  ;;  %1464 = vrcp.f32 %v1008_v57 }
 0x30e   : > { %v1449_v61 = vpop.eup %1448  ;;  %1052 = vst.msk [vmem:[%s1808_s6 + $0x20] sm:$0xff] %vm600_vm1, %v1447_v60  ;;  %1466 = vrcp.f32 %v1011_v59 }
 0x30f   : > { %v1451_v62 = vpop.eup %1450  ;;  %v1010_v63 = vadd.f32 1.0, %v1449_v61 }
 0x310   : > { %v1453_v0 = vpop.eup %1452  ;;  %v1013_v1 = vadd.f32 1.0, %v1451_v62 }
 0x311   : > { %v1455_v2 = vpop.eup %1454  ;;  %1055 = vst.msk [vmem:[%s1808_s6 + $0x38] sm:$0xff] %vm600_vm1, %v1453_v0  ;;  %1468 = vrcp.f32 %v1010_v63 }
 0x312   : > { %1470 = vrcp.f32 %v1013_v1  ;;  %v1012_v3 = vadd.f32 1.0, %v1455_v2 }
 0x313   : > { %v1457_v4 = vpop.eup %1456 }
 0x314   : > { %v1459_v5 = vpop.eup %1458  ;;  %1054 = vst.msk [vmem:[%s1808_s6 + $0x30] sm:$0xff] %vm600_vm1, %v1457_v4  ;;  %1472 = vrcp.f32 %v1012_v3 }
 0x315   : > { %v1461_v6 = vpop.eup %1460  ;;  %1057 = vst.msk [vmem:[%s1808_s6 + $0x48] sm:$0xff] %vm600_vm1, %v1459_v5 }
 0x316   : > { %v1463_v7 = vpop.eup %1462  ;;  %v1015_v8 = vadd.f32 1.0, %v1461_v6 }
 0x317   : > { %v1465_v9 = vpop.eup %1464  ;;  %v1014_v10 = vadd.f32 1.0, %v1463_v7 }
 0x318   : > { %v1467_v11 = vpop.eup %1466  ;;  %1056 = vst.msk [vmem:[%s1808_s6 + $0x40] sm:$0xff] %vm600_vm1, %v1465_v9  ;;  %1474 = vrcp.f32 %v1015_v8 }
 0x319   : > { %1059 = vst.msk [vmem:[%s1808_s6 + $0x58] sm:$0xff] %vm600_vm1, %v1467_v11  ;;  %1476 = vrcp.f32 %v1014_v10 }
 0x31b   : > { %v1469_v12 = vpop.eup %1468 }
 0x31c   : > { %v1471_v13 = vpop.eup %1470  ;;  %1058 = vst.msk [vmem:[%s1808_s6 + $0x50] sm:$0xff] %vm600_vm1, %v1469_v12 }
 0x31d   : > { %1061 = vst.msk [vmem:[%s1808_s6 + $0x68] sm:$0xff] %vm600_vm1, %v1471_v13 }
 0x31e   : > { %v1473_v14 = vpop.eup %1472 }
 0x31f   : > { %1060 = vst.msk [vmem:[%s1808_s6 + $0x60] sm:$0xff] %vm600_vm1, %v1473_v14 }
 0x322   : > { %v1475_v15 = vpop.eup %1474 }
 0x323   : > { %v1477_v16 = vpop.eup %1476  ;;  %1063 = vst.msk [vmem:[%s1808_s6 + $0x78] sm:$0xff] %vm600_vm1, %v1475_v15 }
 0x324   : > { %1062 = vst.msk [vmem:[%s1808_s6 + $0x70] sm:$0xff] %vm600_vm1, %v1477_v16 }
 0x325 PF: > { %s19_s25 = sadd.s32 1, %s1606_s25   ;;  %s2170_s21 = sld [smem:[#allocation9_spill]] }
 0x326   : > { %p16_p10 = scmp.ge.s32.totalorder %s19_s25, 10   ;;  %s2171_s23 = sld [smem:[#allocation10_spill]] }
 0x327   : > { %s2172_s18 = smov %s1582_s19  ;;  %s2173_s19 = smov %s1586_s20 }
 0x328   : > { %s2174_s20 = smov %s1760_s15  ;;  %s2175_s22 = smov %s1602_s24 }
 0x329   : > { %s2176_s24 = smov %s2182_s10  ;;  %18 = sbr.rel (!%p16_p10) target bundleno = 8 (0x8), region = 92 }
 0x330   :  { %1085 = vsyncpa [#allocation4], 1 }
 0x331   :  { %1087 = vsyncpa [#allocation4 + $0x1], 1 }
 0x332   :  { %1088 = vsyncpa [#allocation6], 1 }

</bundles_post_ra>
